<compile_context>
chip_gen: v5e
topology: v5e:2x2
jax: 0.10.0
libtpu: 0.0.40
codegen_flags: <defaults>
</compile_context>

<pallas_src>
import jax
import jax.numpy as jnp
from jax import lax
from jax.experimental import pallas as pl
from jax.experimental.pallas import tpu as pltpu


def _round_up(v, m):
    return ((v + m - 1) // m) * m


def _loha_linear_kernel(x_ref, w_orig_ref, b_ref,
                        w1a_ref, w1b_ref, w2a_ref, w2b_ref,
                        o_ref, acc_ref):
    """One (i, j, k) grid step of y = x @ (W_orig + (W1a@W1b)*(W2a@W2b)*s)^T + b."""
    k = pl.program_id(2)

    @pl.when(k == 0)
    def _init():
        acc_ref[...] = jnp.zeros_like(acc_ref)

    # Rank-factor matmuls on the MXU.  alpha/rank is pre-folded into w1a and the
    # factors are pre-cast to x.dtype in the wrapper.  w1b/w2b are VMEM-resident
    # [K/tk, R, tk] strips; a first-axis index selects the current K chunk
    # (no per-step re-DMA of the rank factors).
    w1b_k = w1b_ref[k]                                                     # [R, tk]
    w2b_k = w2b_ref[k]                                                     # [R, tk]
    w1 = jnp.dot(w1a_ref[...], w1b_k, preferred_element_type=jnp.float32)  # [tn, tk] f32
    w2 = jnp.dot(w2a_ref[...], w2b_k, preferred_element_type=jnp.float32)  # [tn, tk] f32

    # LoHa delta + original weight, kept in the MXU operand dtype (x.dtype) so the
    # elementwise chain is ~2 full-tile VPU passes (mul, add) instead of an f32
    # up-cast / add / down-cast chain over the whole [tn, tk] tile.
    w_total = w_orig_ref[...].astype(x_ref.dtype) + (w1 * w2).astype(x_ref.dtype)

    # acc[tm, tn] += x[tm, tk] . w_total[tn, tk] contracted on the shared K axis.
    # This is the same A @ B^T form as q @ k^T in flash attention: the MXU latches
    # the RHS directly, no XLU transpose / extra VMEM temporary is materialized.
    acc_ref[...] += lax.dot_general(
        x_ref[...], w_total,
        dimension_numbers=(((1,), (1,)), ((), ())),
        preferred_element_type=jnp.float32)

    @pl.when(k == pl.num_programs(2) - 1)
    def _finalize():
        o_ref[...] = (acc_ref[...] + b_ref[...].astype(jnp.float32)).astype(o_ref.dtype)


def loha_linear_forward(x, w_orig, bias, w1a, w1b, w2a, w2b, alpha, rank,
                        *, tm=512, tn=512, tk=512, out_dtype=None):
    """LoHa forward for a Linear orig_module in one tiled Pallas call.

    x:        [M, in]
    w_orig:   [out, in]      (PyTorch nn.Linear.weight layout)
    bias:     [out] or None
    w1a/w2a:  [out, rank]
    w1b/w2b:  [rank, in]
    """
    M, K = x.shape
    N, K2 = w_orig.shape
    assert K2 == K, "w_orig in_features must match x"
    R = w1a.shape[1]
    assert rank == R
    assert w1b.shape == (R, K) and w2a.shape == (N, R) and w2b.shape == (R, K)
    scale = float(alpha) / float(rank)
    out_dtype = x.dtype if out_dtype is None else out_dtype
    if bias is None:
        bias = jnp.zeros((N,), dtype=jnp.float32)

    # ---- tile selection -------------------------------------------------------
    # tm: sublane axis of x/out (multiple of 8); tn/tk: lane axes (multiple of 128).
    tm = max(8,   min(_round_up(tm, 8),   _round_up(M, 8)))
    tn = max(128, min(_round_up(tn, 128), _round_up(N, 128)))
    tk = max(128, min(_round_up(tk, 128), _round_up(K, 128)))
    Mp, Np, Kp = _round_up(M, tm), _round_up(N, tn), _round_up(K, tk)

    # v7x has 2 TensorCores: make sure the parallel grid axes have >= 2 blocks.
    while (Mp // tm) * (Np // tn) < 2 and tn % 256 == 0 and Np % (tn // 2) == 0:
        tn //= 2

    m_rep, n_rep, kt = Mp // tm, Np // tn, Kp // tk
    grid = (m_rep, n_rep, kt)

    # ---- wrapper-side data prep (tiny ops, outside the kernel) ---------------
    f_dtype = x.dtype     # MXU operand dtype for the rank factors / delta

    def _pad2(a, r, c):
        pr, pc = r - a.shape[0], c - a.shape[1]
        return jnp.pad(a, ((0, pr), (0, pc))) if (pr or pc) else a

    x_p      = _pad2(x, Mp, Kp)
    w_orig_p = _pad2(w_orig, Np, Kp)
    bias_p   = jnp.pad(bias, (0, Np - N)) if Np != N else bias
    bias2d   = bias_p.reshape(1, Np)

    # Fold alpha/rank into the small w1_a factor; cast factors to the operand dtype.
    w1a_s = (w1a.astype(jnp.float32) * scale).astype(f_dtype)
    w2a_c = w2a.astype(f_dtype)
    w1a_s = _pad2(w1a_s, Np, R)
    w2a_c = _pad2(w2a_c, Np, R)

    # Reshape the [R, K] factors into k-indexed [kt, R, tk] strips: with a constant
    # block index they are DMA'd into VMEM exactly once and stay resident.
    w1b_r = _pad2(w1b.astype(f_dtype), R, Kp).reshape(R, kt, tk).transpose(1, 0, 2)
    w2b_r = _pad2(w2b.astype(f_dtype), R, Kp).reshape(R, kt, tk).transpose(1, 0, 2)

    # ---- w_orig stream spec (optionally triple-buffered for small-M streaming) --
    deep_prefetch = (m_rep <= 2) and (n_rep * kt >= 8)
    w_orig_spec = pl.BlockSpec((tn, tk), lambda i, j, k: (j, k))
    if deep_prefetch:
        try:
            w_orig_spec = pl.BlockSpec((tn, tk), lambda i, j, k: (j, k),
                                       pipeline_mode=pl.Buffered(3))
        except TypeError:
            pass  # older BlockSpec signature: fall back to default double-buffering

    # ---- VMEM budget (per-array itemsizes) ------------------------------------
    x_i, w_i = x.dtype.itemsize, w_orig.dtype.itemsize
    f_i, o_i = jnp.dtype(f_dtype).itemsize, jnp.dtype(out_dtype).itemsize
    r_pad = max(8, R)
    n_wbuf = 3 if deep_prefetch else 2
    est = (2 * tm * tk * x_i                 # x tiles (double buffered)
           + n_wbuf * tn * tk * w_i          # w_orig tiles
           + 2 * tn * 4                      # bias tile
           + 2 * 2 * tn * 128 * f_i          # w1a/w2a tiles (lane-padded to 128)
           + 2 * 2 * r_pad * Kp * f_i        # resident w1b/w2b strips
           + 2 * tm * tn * o_i               # output tiles
           + tm * tn * 4                     # f32 accumulator scratch
           + 4 * tn * tk * 4)                # f32 temporaries (w1, w2, delta, w_total)
    try:
        vmem_cap = int(pltpu.get_tpu_info().vmem_capacity_bytes)
    except Exception:
        vmem_cap = 64 * 1024 * 1024          # conservative (v7x per-TC size)
    vmem_limit = int(min(max(int(1.5 * est), 32 * 1024 * 1024), int(0.7 * vmem_cap)))

    # ---- cost estimate reflecting actual tiled HBM traffic --------------------
    cost = pl.CostEstimate(
        flops=int(2 * Mp * Np * Kp                       # main matmul
                  + m_rep * (4 * Np * Kp * R             # rank matmuls (per M tile)
                             + 2 * Np * Kp)),            # Hadamard + add
        transcendentals=0,
        bytes_accessed=int(n_rep * Mp * Kp * x_i         # x re-read per N tile
                           + m_rep * Np * Kp * w_i       # w_orig re-read per M tile
                           + m_rep * (2 * Np * R * f_i + Np * 4)
                           + 2 * R * Kp * f_i            # resident factors, once
                           + Mp * Np * o_i))             # output write

    out = pl.pallas_call(
        _loha_linear_kernel,
        out_shape=jax.ShapeDtypeStruct((Mp, Np), out_dtype),
        grid_spec=pltpu.PrefetchScalarGridSpec(
            num_scalar_prefetch=0,
            grid=grid,
            in_specs=[
                pl.BlockSpec((tm, tk), lambda i, j, k: (i, k)),       # x
                w_orig_spec,                                          # w_orig
                pl.BlockSpec((1, tn), lambda i, j, k: (0, j)),        # bias
                pl.BlockSpec((tn, R), lambda i, j, k: (j, 0)),        # hada_w1_a (scaled)
                pl.BlockSpec((kt, R, tk), lambda i, j, k: (0, 0, 0)),  # hada_w1_b (resident)
                pl.BlockSpec((tn, R), lambda i, j, k: (j, 0)),        # hada_w2_a
                pl.BlockSpec((kt, R, tk), lambda i, j, k: (0, 0, 0)),  # hada_w2_b (resident)
            ],
            out_specs=pl.BlockSpec((tm, tn), lambda i, j, k: (i, j)),
            scratch_shapes=[pltpu.VMEM((tm, tn), jnp.float32)],
        ),
        compiler_params=pltpu.CompilerParams(
            dimension_semantics=("parallel", "parallel", "arbitrary"),
            vmem_limit_bytes=vmem_limit),
        cost_estimate=cost,
    )(x_p, w_orig_p, bias2d, w1a_s, w1b_r, w2a_c, w2b_r)

    if (Mp, Np) != (M, N):
        out = out[:M, :N]
    return out


def loha_linear_reference(x, w_orig, bias, w1a, w1b, w2a, w2b, alpha, rank):
    scale = alpha / rank
    w = (w1a @ w1b) * (w2a @ w2b) * scale
    y = x @ w_orig.T + x @ w.T
    return y + bias if bias is not None else y


if __name__ == "__main__":
    key = jax.random.PRNGKey(0)

    def make_case(key, m, n_in, n_out, rank):
        k_x, k_w, k_b, k_1a, k_1b, k_2a, k_2b = jax.random.split(key, 7)
        x = jax.random.normal(k_x, (m, n_in), dtype=jnp.float32)
        w_orig = jax.random.normal(k_w, (n_out, n_in), dtype=jnp.float32) * 0.05
        bias = jax.random.normal(k_b, (n_out,), dtype=jnp.float32) * 0.05
        # LoHa parameters (hada_w2_a gets a nonzero init so the delta path is tested;
        # the module itself initializes it to zero).
        w1a = jax.random.normal(k_1a, (n_out, rank), dtype=jnp.float32) * 0.1
        w1b = jax.random.normal(k_1b, (rank, n_in), dtype=jnp.float32)
        w2a = jax.random.normal(k_2a, (n_out, rank), dtype=jnp.float32) * 0.1
        w2b = jax.random.normal(k_2b, (rank, n_in), dtype=jnp.float32)
        return x, w_orig, bias, w1a, w1b, w2a, w2b

    # Case 1: small shapes, tile-divisible, tiles chosen so the grid is (1, 2, 2)
    # and both the K-accumulation and N-tiling paths are exercised.
    args1 = make_case(key, 8, 256, 256, 8)
    out1 = loha_linear_forward(*args1, alpha=16.0, rank=8, tm=8, tn=128, tk=128)
    out1 = jax.block_until_ready(out1)
    ref1 = loha_linear_reference(*args1, alpha=16.0, rank=8)
    assert out1.shape == ref1.shape
    assert jnp.allclose(out1, ref1, atol=1e-3, rtol=1e-3), "case 1 mismatch vs reference"

    # Case 2: non-tile-divisible shapes (exercises the zero-pad + slice path).
    args2 = make_case(jax.random.PRNGKey(1), 5, 200, 72, 4)
    out2 = loha_linear_forward(*args2, alpha=8.0, rank=4)   # default (big) tiles, clamped
    out2 = jax.block_until_ready(out2)
    ref2 = loha_linear_reference(*args2, alpha=8.0, rank=4)
    assert out2.shape == ref2.shape
    assert jnp.allclose(out2, ref2, atol=1e-3, rtol=1e-3), "case 2 mismatch vs reference"

    # TODO(synk): Conv2d orig_module variant (F.conv2d with the LoHa weight reshaped
    # to [out, in/groups, kh, kw] and stride/padding/dilation/groups) is not
    # implemented here; only the nn.Linear path is.
    print("KERNEL_OK")
</pallas_src>

<mosaic_0001>
module attributes {stable_mosaic.version = 11 : i64} {
  func.func @_loha_linear_kernel(%arg0: i32, %arg1: i32, %arg2: i32, %arg3: memref<8x128xf32, #tpu.memory_space<vmem>>, %arg4: memref<128x128xf32, #tpu.memory_space<vmem>>, %arg5: memref<1x128xf32, #tpu.memory_space<vmem>>, %arg6: memref<128x8xf32, #tpu.memory_space<vmem>>, %arg7: memref<2x8x128xf32, #tpu.memory_space<vmem>>, %arg8: memref<128x8xf32, #tpu.memory_space<vmem>>, %arg9: memref<2x8x128xf32, #tpu.memory_space<vmem>>, %arg10: memref<8x128xf32, #tpu.memory_space<vmem>>, %arg11: memref<8x128xf32, #tpu.memory_space<vmem>>) attributes {dimension_semantics = [#tpu.dimension_semantics<parallel>, #tpu.dimension_semantics<parallel>, #tpu.dimension_semantics<arbitrary>], iteration_bounds = array<i64: 1, 2, 2>, scalar_prefetch = 0 : i64, scratch_operands = 1 : i64, tpu.core_type = #tpu.core_type<tc>, window_params = [{transform_indices = @transform_0, window_bounds = array<i64: 8, 128>}, {transform_indices = @transform_1, window_bounds = array<i64: 128, 128>}, {transform_indices = @transform_2, window_bounds = array<i64: 1, 128>}, {transform_indices = @transform_3, window_bounds = array<i64: 128, 8>}, {pipeline_mode = #tpu.pipeline_mode<synchronous>, transform_indices = @transform_4, window_bounds = array<i64: 2, 8, 128>}, {transform_indices = @transform_5, window_bounds = array<i64: 128, 8>}, {pipeline_mode = #tpu.pipeline_mode<synchronous>, transform_indices = @transform_6, window_bounds = array<i64: 2, 8, 128>}, {transform_indices = @transform_7, window_bounds = array<i64: 8, 128>}]} {
    %c0_i32 = arith.constant 0 : i32
    %0 = arith.cmpi eq, %arg2, %c0_i32 : i32
    %1 = arith.extui %0 : i1 to i32
    %c0_i32_0 = arith.constant 0 : i32
    %2 = arith.cmpi ne, %1, %c0_i32_0 : i32
    scf.if %2 {
      %cst_19 = arith.constant 0.000000e+00 : f32
      %24 = vector.broadcast %cst_19 : f32 to vector<8x128xf32>
      %c0_20 = arith.constant 0 : index
      %c0_21 = arith.constant 0 : index
      %25 = vector.load %arg11[%c0_20, %c0_21] : memref<8x128xf32, #tpu.memory_space<vmem>>, vector<8x128xf32>
      tpu.vector_store %arg11[%c0_20, %c0_21], %24 {strides = array<i32>} : memref<8x128xf32, #tpu.memory_space<vmem>>, vector<8x128xf32>,
    } else {
    }
    %3 = arith.index_cast %arg2 : i32 to index
    %c0 = arith.constant 0 : index
    %c0_1 = arith.constant 0 : index
    %4 = vector.load %arg7[%3, %c0, %c0_1] : memref<2x8x128xf32, #tpu.memory_space<vmem>>, vector<1x8x128xf32>
    %5 = vector.shape_cast %4 : vector<1x8x128xf32> to vector<8x128xf32>
    %6 = arith.index_cast %arg2 : i32 to index
    %c0_2 = arith.constant 0 : index
    %c0_3 = arith.constant 0 : index
    %7 = vector.load %arg9[%6, %c0_2, %c0_3] : memref<2x8x128xf32, #tpu.memory_space<vmem>>, vector<1x8x128xf32>
    %8 = vector.shape_cast %7 : vector<1x8x128xf32> to vector<8x128xf32>
    %c0_4 = arith.constant 0 : index
    %c0_5 = arith.constant 0 : index
    %9 = vector.load %arg6[%c0_4, %c0_5] : memref<128x8xf32, #tpu.memory_space<vmem>>, vector<128x8xf32>
    %cst = arith.constant dense<0.000000e+00> : vector<128x128xf32>
    %10 = tpu.matmul %9, %5, %cst {dimension_numbers = #tpu.dot_dimension_numbers<[1], [0], [0], [1], [0, 0, 1, 1], [], []>} : vector<128x8xf32>, vector<8x128xf32>, vector<128x128xf32> -> vector<128x128xf32>
    %c0_6 = arith.constant 0 : index
    %c0_7 = arith.constant 0 : index
    %11 = vector.load %arg8[%c0_6, %c0_7] : memref<128x8xf32, #tpu.memory_space<vmem>>, vector<128x8xf32>
    %cst_8 = arith.constant dense<0.000000e+00> : vector<128x128xf32>
    %12 = tpu.matmul %11, %8, %cst_8 {dimension_numbers = #tpu.dot_dimension_numbers<[1], [0], [0], [1], [0, 0, 1, 1], [], []>} : vector<128x8xf32>, vector<8x128xf32>, vector<128x128xf32> -> vector<128x128xf32>
    %c0_9 = arith.constant 0 : index
    %c0_10 = arith.constant 0 : index
    %13 = vector.load %arg4[%c0_9, %c0_10] : memref<128x128xf32, #tpu.memory_space<vmem>>, vector<128x128xf32>
    %14 = arith.mulf %10, %12 : vector<128x128xf32>
    %15 = arith.addf %13, %14 : vector<128x128xf32>
    %c0_11 = arith.constant 0 : index
    %c0_12 = arith.constant 0 : index
    %16 = vector.load %arg11[%c0_11, %c0_12] : memref<8x128xf32, #tpu.memory_space<vmem>>, vector<8x128xf32>
    %c0_13 = arith.constant 0 : index
    %c0_14 = arith.constant 0 : index
    %17 = vector.load %arg3[%c0_13, %c0_14] : memref<8x128xf32, #tpu.memory_space<vmem>>, vector<8x128xf32>
    %cst_15 = arith.constant dense<0.000000e+00> : vector<8x128xf32>
    %18 = tpu.matmul %17, %15, %cst_15 {dimension_numbers = #tpu.dot_dimension_numbers<[1], [1], [0], [0], [0, 0, 1, 0], [], []>} : vector<8x128xf32>, vector<128x128xf32>, vector<8x128xf32> -> vector<8x128xf32>
    %19 = arith.addf %16, %18 : vector<8x128xf32>
    %c0_16 = arith.constant 0 : index
    %c0_17 = arith.constant 0 : index
    %20 = vector.load %arg11[%c0_16, %c0_17] : memref<8x128xf32, #tpu.memory_space<vmem>>, vector<8x128xf32>
    tpu.vector_store %arg11[%c0_16, %c0_17], %19 {strides = array<i32>} : memref<8x128xf32, #tpu.memory_space<vmem>>, vector<8x128xf32>,
    %c1_i32 = arith.constant 1 : i32
    %21 = arith.cmpi eq, %arg2, %c1_i32 : i32
    %22 = arith.extui %21 : i1 to i32
    %c0_i32_18 = arith.constant 0 : i32
    %23 = arith.cmpi ne, %22, %c0_i32_18 : i32
    scf.if %23 {
      %c0_19 = arith.constant 0 : index
      %c0_20 = arith.constant 0 : index
      %24 = vector.load %arg11[%c0_19, %c0_20] : memref<8x128xf32, #tpu.memory_space<vmem>>, vector<8x128xf32>
      %c0_21 = arith.constant 0 : index
      %c0_22 = arith.constant 0 : index
      %25 = vector.load %arg5[%c0_21, %c0_22] : memref<1x128xf32, #tpu.memory_space<vmem>>, vector<1x128xf32>
      %26 = vector.broadcast %25 : vector<1x128xf32> to vector<8x128xf32>
      %27 = arith.addf %24, %26 : vector<8x128xf32>
      %c0_23 = arith.constant 0 : index
      %c0_24 = arith.constant 0 : index
      %28 = vector.load %arg10[%c0_23, %c0_24] : memref<8x128xf32, #tpu.memory_space<vmem>>, vector<8x128xf32>
      tpu.vector_store %arg10[%c0_23, %c0_24], %27 {strides = array<i32>} : memref<8x128xf32, #tpu.memory_space<vmem>>, vector<8x128xf32>,
    } else {
    }
    return
  }
  func.func @transform_0(%arg0: i32, %arg1: i32, %arg2: i32) -> (i32, i32) {
    %c0_i32 = arith.constant 0 : i32
    return %arg0, %arg2 : i32, i32
  }
  func.func @transform_1(%arg0: i32, %arg1: i32, %arg2: i32) -> (i32, i32) {
    %c0_i32 = arith.constant 0 : i32
    return %arg1, %arg2 : i32, i32
  }
  func.func @transform_2(%arg0: i32, %arg1: i32, %arg2: i32) -> (i32, i32) {
    %c0_i32 = arith.constant 0 : i32
    %c0_i32_0 = arith.constant 0 : i32
    return %c0_i32, %arg1 : i32, i32
  }
  func.func @transform_3(%arg0: i32, %arg1: i32, %arg2: i32) -> (i32, i32) {
    %c0_i32 = arith.constant 0 : i32
    %c0_i32_0 = arith.constant 0 : i32
    return %arg1, %c0_i32 : i32, i32
  }
  func.func @transform_4(%arg0: i32, %arg1: i32, %arg2: i32) -> (i32, i32, i32) {
    %c0_i32 = arith.constant 0 : i32
    %c0_i32_0 = arith.constant 0 : i32
    %c0_i32_1 = arith.constant 0 : i32
    %c0_i32_2 = arith.constant 0 : i32
    return %c0_i32, %c0_i32_0, %c0_i32_1 : i32, i32, i32
  }
  func.func @transform_5(%arg0: i32, %arg1: i32, %arg2: i32) -> (i32, i32) {
    %c0_i32 = arith.constant 0 : i32
    %c0_i32_0 = arith.constant 0 : i32
    return %arg1, %c0_i32 : i32, i32
  }
  func.func @transform_6(%arg0: i32, %arg1: i32, %arg2: i32) -> (i32, i32, i32) {
    %c0_i32 = arith.constant 0 : i32
    %c0_i32_0 = arith.constant 0 : i32
    %c0_i32_1 = arith.constant 0 : i32
    %c0_i32_2 = arith.constant 0 : i32
    return %c0_i32, %c0_i32_0, %c0_i32_1 : i32, i32, i32
  }
  func.func @transform_7(%arg0: i32, %arg1: i32, %arg2: i32) -> (i32, i32) {
    %c0_i32 = arith.constant 0 : i32
    return %arg0, %arg1 : i32, i32
  }
}

</mosaic_0001>

<bundles_post_ra>
// kernel: tpu_custom_call.1
= control target key start
LH: loop header
LB: loop body
LE: loop exit
PB: predicated region body
PF: predicated region fallthrough
CT: control target
= control target key end

     0   :  { %s1797_s0 = inlined_call_operand.vmem [shape: f32[8,256], index: 0, kind: input, shape index: {}]   ;;  %s1798_s1 = inlined_call_operand.vmem [shape: f32[256,256], index: 1, kind: input, shape index: {}]   ;;  %s1799_s2 = inlined_call_operand.hbm [shape: f32[1,256], index: 2, kind: input, shape index: {}]   ;;  %s1800_s3 = inlined_call_operand.vmem [shape: f32[256,8], index: 3, kind: input, shape index: {}]   ;;  %s1801_s4 = inlined_call_operand.vmem [shape: f32[2,8,128], index: 4, kind: input, shape index: {}]   ;;  %s1802_s5 = inlined_call_operand.vmem [shape: f32[256,8], index: 5, kind: input, shape index: {}]   ;;  %s1803_s6 = inlined_call_operand.hbm [shape: f32[2,8,128], index: 6, kind: input, shape index: {}]   ;;  %s1804_s7 = inlined_call_operand.hbm [shape: f32[8,256], index: 7, kind: output, shape index: {}]  }
   0x1   :  { %1812 = sst [smem:[#allocation20_spill]] %s1801_s4 }
   0x2   :  { %1813 = sst [smem:[#allocation21_spill]] %s1803_s6 }
   0x3   :  { %1814 = sst [smem:[#allocation22_spill]] %s1804_s7 }
   0x4   :  { %12 = vsyncpa [#allocation5], 0 }
   0x5   :  { %14 = vsyncpa [#allocation5 + $0x1], 0 }
   0x6   :  { %15 = vsyncpa [#allocation8], 0 }
   0x7   :  { %16 = vsyncpa [#allocation6], 0 }
   0x8   :  { %18 = vsyncpa [#allocation6 + $0x1], 0  ;;  %s1440_s24 = smov 0   ;;  %s1442_s25 = smov 0  }
   0x9   :  { %s1444_s26 = smov 0   ;;  %s1446_s27 = smov 0  }
   0xa   :  { %s1448_s28 = smov 0   ;;  %s1450_s29 = smov 0  }
   0xb   :  { %s1452_s30 = smov 0   ;;  %s1454_s8 = smov 0  }
   0xc   :  { %s1456_s9 = smov 0   ;;  %s1458_s10 = smov 0  }
   0xd LB: > { %1815 = sst [smem:[#allocation13_spill]] %s1358_s24  ;;  %s1054_s11 = sadd.s32 4294967295, %s1394_s10   ;;  %s1394_s10 = sphi %s1458_s10, %s24_s10   ;;  %s1390_s9 = sphi %s1456_s9, %s1848_s9   ;;  %s1386_s8 = sphi %s1454_s8, %s1847_s8   ;;  %s1382_s30 = sphi %s1452_s30, %s1846_s30   ;;  %s1378_s29 = sphi %s1450_s29, %s1845_s29   ;;  %s1374_s28 = sphi %s1448_s28, %s1844_s28   ;;  %s1370_s27 = sphi %s1446_s27, %s1843_s27   ;;  %s1366_s26 = sphi %s1444_s26, %s1842_s26   ;;  %s1362_s25 = sphi %s1442_s25, %s1841_s25   ;;  %s1358_s24 = sphi %s1440_s24, %s1840_s24  }
   0xe   : > { %s1055_s12 = sadd.s32 4294967294, %s1394_s10   ;;  %s36_s13 = sadd.s32 1, %s1386_s8 }
   0xf   : > { %s39_s14 = sadd.s32 1, %s1390_s9  ;;  %p37_p0 = scmp.ge.s32.totalorder %s36_s13, 2 }
  0x10   : > { %s80_s15 = sadd.s32 1, %s1374_s28  ;;  %p87_p1 = scmp.ne.s32.totalorder %s1374_s28, %s1370_s27 }
  0x11   : > { %p88_p2 = scmp.eq.s32.totalorder %s1394_s10, 0  ;;  %s1850_s13 = smov (%p37_p0, %s36_s13), 0 }
  0x12   : > { %1816 = sst [smem:[#allocation14_spill]] %s1850_s13  ;;  %s1852_s14 = smov (!%p37_p0, %s39_s14), %s1390_s9 }
  0x13   : > { %s76_s16 = ssub.s32 %s1386_s8, %s1850_s13  ;;  %p1503_p3 = por %p88_p2, %p87_p1 }
  0x14   : > { %p41_p4 = scmp.ge.s32.totalorder %s1852_s14, 2  ;;  %s106_s18 = sadd.s32 1, %s1366_s26 }
  0x15   : > { %p113_p5 = scmp.ne.s32.totalorder %s1366_s26, %s1362_s25  ;;  %p119_p6 = scmp.ne.s32.totalorder %s1362_s25, %s1358_s24 }
  0x16   : > { %s1854_s14 = smov (%p41_p4, %s1852_s14), 0  ;;  %p1521_p8 = scmp.eq.s32.totalorder %s1054_s11, 0 }
  0x17   : > { %1818 = sst [smem:[#allocation15_spill]] %s1854_s14  ;;  %p1517_p7 = por %p113_p5, %p88_p2 }
  0x18   : > { %s75_s21 = ssub.s32 %s1390_s9, %s1854_s14  ;;  %p239_p9 = scmp.eq.s32.totalorder %s1054_s11, 3 }
  0x19   : > { %s1819_s19 = scalar_select %p1517_p7, 1, 0 }
  0x1a   : > { %s77_s22 = sor.u32 %s76_s16, %s75_s21  ;;  %p104_p10 = scmp.eq.s32.totalorder %s75_s21, 0 }
  0x1b   : > { %p78_p11 = scmp.eq.s32.totalorder %s77_s22, 0  ;;  %p1532_p12 = por %p1521_p8, %p119_p6 }
  0x1c   : > { %s1537_s13 = scalar_select %p104_p10, %s1366_s26, %s106_s18  }
  0x1d   : > { %s1540_s7 = scalar_select %p78_p11, %s1374_s28, %s80_s15  }
  0x1e   : > { %1822 = sst [smem:[#allocation16_spill]] %s1537_s13  ;;  %p1545_p13 = por %p239_p9, %p113_p5 }
  0x1f   : > { %1823 = sst [smem:[#allocation17_spill]] %s1540_s7  ;;  %p245_p0 = scmp.eq.s32.totalorder %s1055_s12, 3 }
  0x20   : > { %s1824_s4 = scalar_select %p1545_p13, 1, 0 }
  0x21   : > { %p1056_p1 = scmp.ge.s32.totalorder %s1394_s10, 1  ;;  %p252_p2 = scmp.lt.s32.totalorder %s1394_s10, 5 }
  0x22   : > { %1825 = sst [smem:[#allocation18_spill]] %s1824_s4  ;;  %p1554_p4 = por %p245_p0, %p119_p6 }
  0x23   : > { %p1558_p7 = pnand %p1056_p1, %p252_p2  ;;  %s1829_s6 = sld [smem:[#allocation21_spill]] }
  0x24   : > { %s1826_s11 = scalar_select %p1554_p4, 1, 0 }
  0x25   : > { %p1122_p5 = pneg %p1558_p7  ;;  %s1396_s12 = smov [#allocation7]  }
  0x26   : > { %1827 = sst [smem:[#allocation19_spill]] %s1826_s11  ;;  %s268_s22 = sshll.u32 %s1396_s12, 4  ;;  %s269_s22 = int_to_ptr.vmem [resolvable:$true] %s268_s22 }
  0x27   : > { %p1123_p6 = pnand %p1122_p5, %p1521_p8  ;;  %s1397_s14 = smov 128  }
  0x28   : > { %s1398_s7 = smov 8   ;;  %p1058_p9 = scmp.ge.s32.totalorder %s1394_s10, 4 }
  0x29   : > { %s266_s21 = sshll.u32 %s1829_s6, 4  ;;  %s267_s21 = int_to_ptr.hbm [resolvable:$true] %s266_s21 }
  0x2a   : > { %1125 = dma.hbm_to_vmem [thread:$0]  (!%p1123_p6), %s267_s21, 256, %s269_s22, [#allocation8], %s1397_s14, %s1397_s14, %s1398_s7  }
  0x2b   : > { %278 = sbr.rel (%p1058_p9) target bundleno = 76 (0x4c), region = 24 }
  0x30   : > { %292 = sbr.rel (!%p1503_p3) target bundleno = 70 (0x46), region = 32  ;;  %s294_s18 = sand.u32 (%p1503_p3), 1, %s1374_s28  }
  0x31   : > { %s1111_s15 = sshll.u32 (%p1503_p3), %s1390_s9, 5  ;;  %s1059_s6 = sshll.u32 (%p1503_p3), %s294_s18, 7 }
  0x32   : > { %s299_s13 = sadd.s32 (%p1503_p3), %s1386_s8, %s1111_s15  ;;  %s296_s7 = scalar_lea.vmem (%p1503_p3), [#allocation3], %s1059_s6 }
  0x33   : > { %s1062_s12 = sshll.u32 (%p1503_p3), %s299_s13, 3 }
  0x34   : > { %s1578_s4 = scalar_lea.vmem (%p1503_p3), %s1798_s1, %s1062_s12 }
  0x35   : > { %v360_v0 = vld [vmem:[%s1578_s4] sm:$0xff]  ;;  %v362_v1 = vld [vmem:[%s1578_s4 + $0x10] sm:$0xff] }
  0x36   : > { %v364_v2 = vld [vmem:[%s1578_s4 + $0x20] sm:$0xff]  ;;  %361 = vst [vmem:[%s296_s7] sm:$0xff] %v360_v0  ;;  %v366_v3 = vld [vmem:[%s1578_s4 + $0x30] sm:$0xff] }
  0x37   : > { %363 = vst [vmem:[%s296_s7 + $0x8] sm:$0xff] %v362_v1  ;;  %v368_v4 = vld [vmem:[%s1578_s4 + $0x40] sm:$0xff]  ;;  %v370_v5 = vld [vmem:[%s1578_s4 + $0x50] sm:$0xff] }
  0x38   : > { %365 = vst [vmem:[%s296_s7 + $0x10] sm:$0xff] %v364_v2  ;;  %v372_v6 = vld [vmem:[%s1578_s4 + $0x60] sm:$0xff]  ;;  %v374_v7 = vld [vmem:[%s1578_s4 + $0x70] sm:$0xff] }
  0x39   : > { %367 = vst [vmem:[%s296_s7 + $0x18] sm:$0xff] %v366_v3  ;;  %v376_v8 = vld [vmem:[%s1578_s4 + $0x80] sm:$0xff]  ;;  %v378_v9 = vld [vmem:[%s1578_s4 + $0x90] sm:$0xff] }
  0x3a   : > { %369 = vst [vmem:[%s296_s7 + $0x20] sm:$0xff] %v368_v4  ;;  %v380_v10 = vld [vmem:[%s1578_s4 + $0xa0] sm:$0xff]  ;;  %v382_v11 = vld [vmem:[%s1578_s4 + $0xb0] sm:$0xff] }
  0x3b   : > { %371 = vst [vmem:[%s296_s7 + $0x28] sm:$0xff] %v370_v5  ;;  %v384_v12 = vld [vmem:[%s1578_s4 + $0xc0] sm:$0xff]  ;;  %v386_v13 = vld [vmem:[%s1578_s4 + $0xd0] sm:$0xff] }
  0x3c   : > { %373 = vst [vmem:[%s296_s7 + $0x30] sm:$0xff] %v372_v6  ;;  %v388_v14 = vld [vmem:[%s1578_s4 + $0xe0] sm:$0xff]  ;;  %v390_v15 = vld [vmem:[%s1578_s4 + $0xf0] sm:$0xff] }
  0x3d   : > { %375 = vst [vmem:[%s296_s7 + $0x38] sm:$0xff] %v374_v7 }
  0x3e   : > { %377 = vst [vmem:[%s296_s7 + $0x40] sm:$0xff] %v376_v8 }
  0x3f   : > { %379 = vst [vmem:[%s296_s7 + $0x48] sm:$0xff] %v378_v9 }
  0x40   : > { %381 = vst [vmem:[%s296_s7 + $0x50] sm:$0xff] %v380_v10 }
  0x41   : > { %383 = vst [vmem:[%s296_s7 + $0x58] sm:$0xff] %v382_v11 }
  0x42   : > { %385 = vst [vmem:[%s296_s7 + $0x60] sm:$0xff] %v384_v12 }
  0x43   : > { %387 = vst [vmem:[%s296_s7 + $0x68] sm:$0xff] %v386_v13 }
  0x44   : > { %389 = vst [vmem:[%s296_s7 + $0x70] sm:$0xff] %v388_v14 }
  0x45   : > { %391 = vst [vmem:[%s296_s7 + $0x78] sm:$0xff] %v390_v15 }
  0x46 PF: > { %s398_s6 = sand.u32 1, %s1366_s26   ;;  %s404_s14 = scalar_lea.hbm %s1799_s2, %s1390_s9 }
  0x47   : > { %s406_s17 = sshll.u32 %s404_s14, 4  ;;  %s401_s11 = scalar_lea.vmem [#allocation4], %s398_s6  ;;  %s407_s17 = int_to_ptr.hbm [resolvable:$true] %s406_s17 }
  0x48   : > { %s408_s21 = sshll.u32 %s401_s11, 4  ;;  %s399_s22 = scalar_lea.sflag [#allocation5], %s398_s6  ;;  %s409_s21 = int_to_ptr.vmem [resolvable:$true] %s408_s21 }
  0x49   : > { %p1830_p3 = scmp.ne.s32.totalorder %s1819_s19, 0 }
  0x4b   : > { %1116 = dma.hbm_to_vmem [thread:$0]  (%p1830_p3), %s407_s17, 16, %s409_s21, %s399_s22  }
  0x4c PF: > { %435 = sbr.rel (%p1558_p7) target bundleno = 542 (0x21e), region = 82  ;;  %s438_s4 = sand.u32 (!%p1558_p7), 1, %s1370_s27  }
  0x4d   : > { %s1607_s18 = sand.u32 (!%p1558_p7), 1, %s1362_s25   ;;  %s1064_s15 = sshll.u32 (!%p1558_p7), %s438_s4, 7 }
  0x4e   : > { %s1609_s12 = scalar_lea.vmem (!%p1558_p7), [#allocation3], %s1064_s15  ;;  %s445_s7 = scalar_lea.sflag (!%p1558_p7), [#allocation5], %s1607_s18 }
  0x4f   : > { %s447_s24 = scalar_lea.vmem (!%p1558_p7), [#allocation4], %s1607_s18 }
  0x51   : > { %1345 = dma.done.wait (%p1532_p12), %s445_s7, 16  }
  0x52   : > { %1347 = vsyncadd (%p1532_p12), %s445_s7, 4294967280 }
  0x53   : > { %1349 = dma.done.wait (%p1521_p8), [#allocation8], 256  }
  0x54   : > { %1351 = vsyncadd (%p1521_p8), [#allocation8], 4294967040  ;;  %s1066_s27 = sshll.u32 %s1607_s18, 3  ;;  %p507_p7 = scmp.lt.s32.totalorder %s1378_s29, 1 }
  0x55   : > { %s1068_s19 = sshll.u32 %s1382_s30, 4  ;;  %s1640_s7 = scalar_lea.vmem [#allocation9], %s1066_s27 }
  0x56   : > { %s508_s16 = scalar_select %p507_p7, %s1378_s29, 1 }
  0x57   : > { %p515_p10 = scmp.lt.s32.totalorder %s1068_s19, 31  ;;  %p1072_p8 = scmp.ne.s32.totalorder %s1378_s29, 0 }
  0x58   : > { %s1067_s6 = sshll.u32 %s508_s16, 3 }
  0x59   : > { %s1628_s23 = scalar_lea.vmem %s1797_s0, %s1067_s6  ;;  %s1856_s19 = smov (!%p515_p10, %s1068_s19), 31 }
  0x5a   : > { %s1069_s17 = sshll.u32 %s1856_s19, 3  ;;  %529 = sbr.rel (%p1072_p8) target bundleno = 97 (0x61), region = 98 }
  0x5b   : > { %s1633_s21 = scalar_lea.vmem %s1800_s3, %s1069_s17  ;;  %s1638_s15 = scalar_lea.vmem %s1802_s5, %s1069_s17 }
  0x5f   : > { %v1399_v16 = vmov 0.0  }
  0x60   : > { %530 = vst [vmem:[#allocation2] sm:$0xff] %v1399_v16 }
  0x61 PF: > { %s1073_s19 = sshll.u32 %s1378_s29, 3  ;;  %s1831_s13 = sld [smem:[#allocation20_spill]]  ;;  %v547_v17 = vld [vmem:[%s1633_s21 + $0x58] sm:$0xff]  ;;  %vm552_vm0 = vcmask 64512   ;;  %v536_v20 = vld [vmem:[%s1633_s21] sm:$0xff]  ;;  %v537_v23 = vld [vmem:[%s1633_s21 + $0x8] sm:$0xff] }
  0x62   : > { %s534_s27 = scalar_lea.vmem [#allocation7], %s1073_s19  ;;  %v666_v21 = vld [vmem:[%s1638_s15] sm:$0xff]  ;;  %v667_v24 = vld [vmem:[%s1638_s15 + $0x8] sm:$0xff]  ;;  %v538_v26 = vld [vmem:[%s1633_s21 + $0x10] sm:$0xff]  ;;  %p1106_p11 = scmp.ne.s32.totalorder %s1378_s29, 1 }
  0x63   : > { %v535_v19 = vld [vmem:[%s534_s27] sm:$0xff]  ;;  %v549_v25 = vld [vmem:[%s1633_s21 + $0x68] sm:$0xff]  ;;  %v668_v27 = vld [vmem:[%s1638_s15 + $0x10] sm:$0xff] }
  0x64   : > { %745 = vmatpush.msra.mxu1 %v535_v19  ;;  %v548_v22 = vld [vmem:[%s1633_s21 + $0x60] sm:$0xff]  ;;  %v550_v28 = vld [vmem:[%s1633_s21 + $0x70] sm:$0xff]  ;;  %v539_v29 = vld [vmem:[%s1633_s21 + $0x18] sm:$0xff] }
  0x65   : > { %1090 = vmatmul.msk.f32.vlgmr.msra.gmra.mxu1 %vm552_vm0, %v666_v21  ;;  %v669_v30 = vld [vmem:[%s1638_s15 + $0x18] sm:$0xff]  ;;  %v540_v32 = vld [vmem:[%s1633_s21 + $0x20] sm:$0xff]  ;;  %v541_v35 = vld [vmem:[%s1633_s21 + $0x28] sm:$0xff] }
  0x66   : > { %v551_v31 = vld [vmem:[%s1633_s21 + $0x78] sm:$0xff]  ;;  %v670_v33 = vld [vmem:[%s1638_s15 + $0x20] sm:$0xff]  ;;  %v671_v36 = vld [vmem:[%s1638_s15 + $0x28] sm:$0xff] }
  0x67   : > { %s532_s14 = scalar_lea.vmem %s1831_s13, %s1073_s19  ;;  %v677_v34 = vld [vmem:[%s1638_s15 + $0x58] sm:$0xff]  ;;  %v678_v37 = vld [vmem:[%s1638_s15 + $0x60] sm:$0xff]  ;;  %v542_v38 = vld [vmem:[%s1633_s21 + $0x30] sm:$0xff] }
  0x68   : > { %v533_v18 = vld [vmem:[%s532_s14] sm:$0xff]  ;;  %v672_v39 = vld [vmem:[%s1638_s15 + $0x30] sm:$0xff]  ;;  %v679_v40 = vld [vmem:[%s1638_s15 + $0x68] sm:$0xff] }
  0x69   : > { %1112 = vmatpush.msra.mxu3 %v533_v18  ;;  %616 = vmatpush.msra.mxu0 %v533_v18  ;;  %v543_v41 = vld [vmem:[%s1633_s21 + $0x38] sm:$0xff]  ;;  %v680_v43 = vld [vmem:[%s1638_s15 + $0x70] sm:$0xff]  ;;  %v544_v44 = vld [vmem:[%s1633_s21 + $0x40] sm:$0xff] }
  0x6a   : > { %1085 = vmatmul.msk.f32.vlgmr.msra.gmra.mxu3 %vm552_vm0, %v547_v17  ;;  %1074 = vmatmul.msk.f32.vlgmr.msra.gmra.mxu0 %vm552_vm0, %v536_v20  ;;  %v673_v42 = vld [vmem:[%s1638_s15 + $0x38] sm:$0xff]  ;;  %v674_v45 = vld [vmem:[%s1638_s15 + $0x40] sm:$0xff]  ;;  %v545_v47 = vld [vmem:[%s1633_s21 + $0x48] sm:$0xff] }
  0x6b   : > { %1113 = vmatpush.msrb.mxu3 %v535_v19  ;;  %v681_v46 = vld [vmem:[%s1638_s15 + $0x78] sm:$0xff]  ;;  %v675_v48 = vld [vmem:[%s1638_s15 + $0x48] sm:$0xff]  ;;  %v546_v49 = vld [vmem:[%s1633_s21 + $0x50] sm:$0xff] }
  0x6c   : > { %v676_v50 = vld [vmem:[%s1638_s15 + $0x50] sm:$0xff]  ;;  %v810_v20 = vld [vmem:[%s1609_s12 + $0x78] sm:$0xff] }
  0x6d   : > { %1091 = vmatmul.msk.f32.gmra.mxu1 %vm552_vm0, %v667_v24  ;;  %v809_v24 = vld [vmem:[%s1609_s12 + $0x70] sm:$0xff] }
  0x72   : > { %1086 = vmatmul.msk.f32.gmra.mxu3 %vm552_vm0, %v548_v22  ;;  %1075 = vmatmul.msk.f32.gmra.mxu0 %vm552_vm0, %v537_v23 }
  0x75   : > { %1092 = vmatmul.msk.f32.gmra.mxu1 %vm552_vm0, %v668_v27 }
  0x7a   : > { %1087 = vmatmul.msk.f32.gmra.mxu3 %vm552_vm0, %v549_v25  ;;  %1076 = vmatmul.msk.f32.gmra.mxu0 %vm552_vm0, %v538_v26 }
  0x7d   : > { %1093 = vmatmul.msk.f32.gmra.mxu1 %vm552_vm0, %v669_v30 }
  0x82   : > { %1088 = vmatmul.msk.f32.gmra.mxu3 %vm552_vm0, %v550_v28  ;;  %1077 = vmatmul.msk.f32.gmra.mxu0 %vm552_vm0, %v539_v29  ;;  %v808_v29 = vld [vmem:[%s1609_s12 + $0x68] sm:$0xff] }
  0x85   : > { %1094 = vmatmul.msk.f32.gmra.mxu1 %vm552_vm0, %v670_v33 }
  0x8a   : > { %1089 = vmatmul.msk.f32.gmra.mxu3 %vm552_vm0, %v551_v31  ;;  %1078 = vmatmul.msk.f32.gmra.mxu0 %vm552_vm0, %v540_v32  ;;  %v807_v32 = vld [vmem:[%s1609_s12 + $0x60] sm:$0xff] }
  0x8d   : > { %1095 = vmatmul.msk.f32.gmra.mxu1 %vm552_vm0, %v671_v36 }
  0x92   : > { %1101 = vmatmul.msk.f32.vlgmr.msrb.gmra.mxu3 %vm552_vm0, %v677_v34  ;;  %1079 = vmatmul.msk.f32.gmra.mxu0 %vm552_vm0, %v541_v35 }
  0x95   : > { %1096 = vmatmul.msk.f32.gmra.mxu1 %vm552_vm0, %v672_v39  ;;  %v805_v39 = vld [vmem:[%s1609_s12 + $0x50] sm:$0xff] }
  0x9a   : > { %1102 = vmatmul.msk.f32.gmra.mxu3 %vm552_vm0, %v678_v37  ;;  %1080 = vmatmul.msk.f32.gmra.mxu0 %vm552_vm0, %v542_v38  ;;  %v806_v37 = vld [vmem:[%s1609_s12 + $0x58] sm:$0xff] }
  0x9d   : > { %1097 = vmatmul.msk.f32.gmra.mxu1 %vm552_vm0, %v673_v42 }
  0xa2   : > { %1103 = vmatmul.msk.f32.gmra.mxu3 %vm552_vm0, %v679_v40  ;;  %1081 = vmatmul.msk.f32.gmra.mxu0 %vm552_vm0, %v543_v41 }
  0xa5   : > { %1098 = vmatmul.msk.f32.gmra.mxu1 %vm552_vm0, %v674_v45 }
  0xaa   : > { %1104 = vmatmul.msk.f32.gmra.mxu3 %vm552_vm0, %v680_v43  ;;  %1082 = vmatmul.msk.f32.gmra.mxu0 %vm552_vm0, %v544_v44  ;;  %v804_v43 = vld [vmem:[%s1609_s12 + $0x48] sm:$0xff] }
  0xad   : > { %1099 = vmatmul.msk.f32.gmra.mxu1 %vm552_vm0, %v675_v48 }
  0xb2   : > { %1105 = vmatmul.msk.f32.gmra.mxu3 %vm552_vm0, %v681_v46  ;;  %1083 = vmatmul.msk.f32.gmra.mxu0 %vm552_vm0, %v545_v47  ;;  %v803_v46 = vld [vmem:[%s1609_s12 + $0x40] sm:$0xff] }
  0xb5   : > { %1100 = vmatmul.msk.f32.gmra.mxu1 %vm552_vm0, %v676_v50 }
  0xba   : > { %1084 = vmatmul.msk.f32.gmra.mxu0 %vm552_vm0, %v546_v49  ;;  %v802_v49 = vld [vmem:[%s1609_s12 + $0x38] sm:$0xff] }
  0xe2   : > { %v747_v52 = vpop.f32.mrf.mxu1 }
  0xe7   : > { %v618_v51 = vpop.f32.mrf.mxu0 }
  0xe8   : > { %v1711_v53 = vmul.f32 %v747_v52, %v618_v51  ;;  %v801_v52 = vld [vmem:[%s1609_s12 + $0x30] sm:$0xff] }
  0xea   : > { %v750_v56 = vpop.f32.mrf.mxu1 }
  0xed   : > { %v651_v54 = vpop.f32.mrf.mxu3 }
  0xef   : > { %v621_v55 = vpop.f32.mrf.mxu0 }
  0xf0   : > { %v1713_v57 = vmul.f32 %v750_v56, %v621_v55  ;;  %v800_v56 = vld [vmem:[%s1609_s12 + $0x28] sm:$0xff] }
  0xf2   : > { %v753_v60 = vpop.f32.mrf.mxu1 }
  0xf5   : > { %v654_v58 = vpop.f32.mrf.mxu3 }
  0xf7   : > { %v624_v59 = vpop.f32.mrf.mxu0 }
  0xf8   : > { %v1715_v61 = vmul.f32 %v753_v60, %v624_v59  ;;  %v799_v59 = vld [vmem:[%s1609_s12 + $0x20] sm:$0xff] }
  0xfa   : > { %v756_v0 = vpop.f32.mrf.mxu1 }
  0xfd   : > { %v657_v62 = vpop.f32.mrf.mxu3 }
  0xff   : > { %v627_v63 = vpop.f32.mrf.mxu0 }
 0x100   : > { %v1717_v1 = vmul.f32 %v756_v0, %v627_v63  ;;  %v797_v0 = vld [vmem:[%s1609_s12 + $0x10] sm:$0xff] }
 0x102   : > { %v759_v4 = vpop.f32.mrf.mxu1 }
 0x105   : > { %v660_v2 = vpop.f32.mrf.mxu3 }
 0x107   : > { %v630_v3 = vpop.f32.mrf.mxu0 }
 0x108   : > { %v1719_v5 = vmul.f32 %v759_v4, %v630_v3  ;;  %v796_v3 = vld [vmem:[%s1609_s12 + $0x8] sm:$0xff] }
 0x109   : > { %v828_v4 = vadd.f32 %v1713_v57, %v796_v3 }
 0x10a   : > { %v762_v8 = vpop.f32.mrf.mxu1  ;;  %v831_v60 = vadd.f32 %v1719_v5, %v799_v59  ;;  %v843_v5 = vld [vmem:[#allocation2] sm:$0xff] }
 0x10d   : > { %v663_v6 = vpop.f32.mrf.mxu3 }
 0x10f   : > { %v633_v7 = vpop.f32.mrf.mxu0 }
 0x112   : > { %v765_v11 = vpop.f32.mrf.mxu1 }
 0x115   : > { %v780_v9 = vpop.f32.mrf.mxu3 }
 0x116   : > { %v822_v35 = vmul.f32 %v780_v9, %v651_v54  ;;  %v816_v54 = vmul.f32 %v762_v8, %v633_v7  ;;  %v844_v8 = vld [vmem:[%s1628_s23] sm:$0xff] }
 0x117   : > { %v636_v10 = vpop.f32.mrf.mxu0 }
 0x118   : > { %v838_v40 = vadd.f32 %v822_v35, %v806_v37  ;;  %v817_v50 = vmul.f32 %v765_v11, %v636_v10 }
 0x11a   : > { %v768_v15 = vpop.f32.mrf.mxu1  ;;  %v833_v55 = vadd.f32 %v817_v50, %v801_v52 }
 0x11d   : > { %v783_v12 = vpop.f32.mrf.mxu3 }
 0x11e   : > { %v823_v30 = vmul.f32 %v783_v12, %v654_v58  ;;  %v832_v58 = vadd.f32 %v816_v54, %v800_v56 }
 0x11f   : > { %v639_v13 = vpop.f32.mrf.mxu0 }
 0x120   : > { %v839_v36 = vadd.f32 %v823_v30, %v807_v32  ;;  %v818_v47 = vmul.f32 %v768_v15, %v639_v13 }
 0x122   : > { %v771_v18 = vpop.f32.mrf.mxu1  ;;  %v834_v51 = vadd.f32 %v818_v47, %v802_v49 }
 0x125   : > { %v786_v14 = vpop.f32.mrf.mxu3 }
 0x126   : > { %v824_v27 = vmul.f32 %v786_v14, %v657_v62  ;;  %v798_v62 = vld [vmem:[%s1609_s12 + $0x18] sm:$0xff] }
 0x127   : > { %v642_v17 = vpop.f32.mrf.mxu0  ;;  %v830_v63 = vadd.f32 %v1717_v1, %v798_v62 }
 0x128   : > { %v840_v31 = vadd.f32 %v824_v27, %v808_v29  ;;  %v819_v44 = vmul.f32 %v771_v18, %v642_v17 }
 0x12a   : > { %v774_v26 = vpop.f32.mrf.mxu1  ;;  %v835_v48 = vadd.f32 %v819_v44, %v803_v46 }
 0x12d   : > { %v789_v16 = vpop.f32.mrf.mxu3 }
 0x12e   : > { %v825_v22 = vmul.f32 %v789_v16, %v660_v2  ;;  %v829_v2 = vadd.f32 %v1715_v61, %v797_v0 }
 0x12f   : > { %v645_v25 = vpop.f32.mrf.mxu0 }
 0x130   : > { %v841_v28 = vadd.f32 %v825_v22, %v809_v24  ;;  %v820_v42 = vmul.f32 %v774_v26, %v645_v25 }
 0x132   : > { %v777_v34 = vpop.f32.mrf.mxu1  ;;  %v836_v45 = vadd.f32 %v820_v42, %v804_v43 }
 0x135   : > { %v792_v19 = vpop.f32.mrf.mxu3 }
 0x136   : > { %v826_v21 = vmul.f32 %v792_v19, %v663_v6  ;;  %v795_v6 = vld [vmem:[%s1609_s12] sm:$0xff] }
 0x137   : > { %v648_v33 = vpop.f32.mrf.mxu0  ;;  %v827_v7 = vadd.f32 %v1711_v53, %v795_v6 }
 0x138   : > { %v842_v23 = vadd.f32 %v826_v21, %v810_v20  ;;  %v821_v38 = vmul.f32 %v777_v34, %v648_v33 }
 0x13a   : > { %845 = vmatpush.xpose.msra.mxu2 %v842_v23  ;;  %v837_v41 = vadd.f32 %v821_v38, %v805_v39 }
 0x13e   : > { %846 = vmatpush.xpose.msra.mxu2 %v841_v28 }
 0x142   : > { %847 = vmatpush.xpose.msra.mxu2 %v840_v31 }
 0x146   : > { %848 = vmatpush.xpose.msra.mxu2 %v839_v36 }
 0x14a   : > { %849 = vmatpush.xpose.msra.mxu2 %v838_v40 }
 0x14e   : > { %850 = vmatpush.xpose.msra.mxu2 %v837_v41 }
 0x152   : > { %851 = vmatpush.xpose.msra.mxu2 %v836_v45 }
 0x156   : > { %852 = vmatpush.xpose.msra.mxu2 %v835_v48 }
 0x15a   : > { %853 = vmatpush.xpose.msra.mxu2 %v834_v51 }
 0x15e   : > { %854 = vmatpush.xpose.msra.mxu2 %v833_v55 }
 0x162   : > { %855 = vmatpush.xpose.msra.mxu2 %v832_v58 }
 0x166   : > { %856 = vmatpush.xpose.msra.mxu2 %v831_v60 }
 0x16a   : > { %857 = vmatpush.xpose.msra.mxu2 %v830_v63 }
 0x16e   : > { %858 = vmatpush.xpose.msra.mxu2 %v829_v2 }
 0x172   : > { %859 = vmatpush.xpose.msra.mxu2 %v828_v4 }
 0x176   : > { %860 = vmatpush.xpose.msra.mxu2 %v827_v7 }
 0x179   : > { %861 = vmatmul.f32.vlgmr.msra.gmra.mxu2 %v844_v8 }
 0x1fb   : > { %870 = sbr.rel (%p1106_p11) target bundleno = 522 (0x20a), region = 102 }
 0x1fc   : > { %v862_v9 = vpop.f32.mrf.mxu2 }
 0x1fd   : > { %v865_v10 = vadd.f32 %v862_v9, %v843_v5 }
 0x1ff   : > { %866 = vst [vmem:[#allocation2] sm:$0xff] %v865_v10 }
 0x200   : > { %v1217_v61 = vld [vmem:[%s447_s24] ss:$0 sm:$0xff] }
 0x206   : > { %v871_v1 = vld [vmem:[#allocation2] sm:$0xff] }
 0x207   : > { %v876_v57 = vadd.f32 %v1217_v61, %v871_v1 }
 0x209   : > { %877 = vst [vmem:[%s1640_s7] sm:$0xff] %v876_v57 }
 0x20a PF: > { %s1108_s23 = sshll.u32 %s1382_s30, 3  ;;  %s1833_s20 = sld [smem:[#allocation22_spill]] }
 0x20b   : > { %s893_s22 = sshll.u32 %s1640_s7, 4  ;;  %s879_s4 = scalar_lea.sflag [#allocation6], %s1607_s18  ;;  %s894_s22 = int_to_ptr.vmem [resolvable:$true] %s893_s22 }
 0x210   : > { %s891_s21 = scalar_lea.hbm %s1833_s20, %s1108_s23  ;;  %s1296_s30 = scalar_lea.hbm %s1833_s20, 16 }
 0x211   : > { %s895_s29 = sshll.u32 %s891_s21, 4  ;;  %s896_s29 = int_to_ptr.hbm [resolvable:$true] %s895_s29 }
 0x212   : > { %s1290_s15 = sshra.s32 %s896_s29, 4  ;;  %s1291_s15 = int_to_ptr.hbm [resolvable:$true] %s1290_s15 }
 0x213   : > { %s1292_s24 = scalar_lea.hbm %s1291_s15, 8  ;;  %p1297_p2 = scmp.lt.s32.totalorder %s1291_s15, %s1833_s20 }
 0x214   : > { %p1293_p12 = scmp.ne.s32.totalorder %s1291_s15, %s1292_s24  ;;  %p1298_p5 = scmp.lt.s32.totalorder %s1296_s30, %s1292_s24 }
 0x216   : > { %p1294_p0 = pnand %p1293_p12, %p1545_p13  ;;  %p1299_p6 = por %p1298_p5, %p1297_p2 }
 0x218   : > { %p1295_p1 = pneg %p1294_p0 }
 0x21a   : > { %p1300_p9 = pnand %p1299_p6, %p1295_p1 }
 0x21c   : > { %1303 = shalt.err (!%p1300_p9)
}
 0x21d   : > { %1120 = dma.vmem_to_hbm [thread:$0]  (%p1545_p13), %s894_s22, 128, %s896_s29, %s879_s4  }
 0x21e PF: > { %s1834_s18 = sld [smem:[#allocation13_spill]]  ;;  %p1132_p3 = scmp.ge.s32.totalorder %s1394_s10, 2 }
 0x220   : > { %p1127_p7 = pnand %p1132_p3, %p1554_p4 }
 0x222   : > { %p1128_p10 = pneg %p1127_p7 }
 0x224   : > { %s907_s14 = sand.u32 1, %s1834_s18  }
 0x225   : > { %s908_s27 = scalar_lea.sflag [#allocation6], %s907_s14 }
 0x226   : > { %1353 = dma.done.wait (%p1128_p10), %s908_s27, 128  }
 0x227   : > { %1355 = vsyncadd (%p1128_p10), %s908_s27, 4294967168  ;;  %s24_s10 = sadd.s32 1, %s1394_s10   ;;  %s1836_s23 = sld [smem:[#allocation16_spill]] }
 0x228   : > { %p21_p8 = scmp.ge.s32.totalorder %s24_s10, 6   ;;  %s1837_s12 = sld [smem:[#allocation17_spill]] }
 0x229   : > { %s1838_s17 = sld [smem:[#allocation14_spill]]  ;;  %s1840_s24 = smov %s1362_s25 }
 0x22a   : > { %s1839_s11 = sld [smem:[#allocation15_spill]]  ;;  %s1841_s25 = smov %s1366_s26 }
 0x22b   : > { %s1843_s27 = smov %s1374_s28  ;;  %s1845_s29 = smov %s1386_s8 }
 0x22c   : > { %s1846_s30 = smov %s1390_s9  ;;  %23 = sbr.rel (!%p21_p8) target bundleno = 13 (0xd), region = 162 }
 0x22d   : > { %s1842_s26 = smov %s1836_s23 }
 0x22e   : > { %s1844_s28 = smov %s1837_s12 }
 0x22f   : > { %s1847_s8 = smov %s1838_s17 }
 0x230   : > { %s1848_s9 = smov %s1839_s11 }
 0x231   :  { %914 = vsyncpa [#allocation5], 1 }
 0x232   :  { %916 = vsyncpa [#allocation5 + $0x1], 1 }
 0x233   :  { %917 = vsyncpa [#allocation8], 1 }
 0x234   :  { %918 = vsyncpa [#allocation6], 1 }
 0x235   :  { %920 = vsyncpa [#allocation6 + $0x1], 1 }

</bundles_post_ra>
